<compile_context>
chip_gen: v7x
topology: tpu7x:2x2x1
jax: 0.10.0
libtpu: 0.0.40
codegen_flags: <defaults>
</compile_context>

<pallas_src>
import jax
import jax.numpy as jnp
from jax.experimental import pallas as pl
from jax.experimental.pallas import tpu as pltpu  # noqa: F401  (TPU backend)


def _autonomous_learning_kernel(inputs_hbm_ref, out_hbm_ref):
    """Fused meta-adapt + online-update stage (both stages are no-ops).

    The output HBM buffer is aliased to the input HBM buffer, so it already
    holds the input bytes: nothing to load, compute, or store.
    """
    # TODO(synk): if real adapt/update rules are ever specified, replace this
    # zero-copy passthrough with actual compute: flatten in the wrapper to a
    # lane-dense layout (last dim a multiple of 128, e.g. (2,4,16,16) ->
    # (16,128)), tile with BlockSpec auto-pipelining (>=512-row blocks,
    # ~0.5-2 MiB per buffer to fit v7x's 64 MiB VMEM with double buffering),
    # and mark independent grid axes "parallel" for v7x's 2 TensorCores.
    del inputs_hbm_ref, out_hbm_ref


def agi_autonomous_learning_forward(inputs: jax.Array) -> jax.Array:
    """Pallas implementation of AGIAutonomousLearning.forward (identity).

    Contract: for a true zero-copy forward, call through
    `agi_autonomous_learning_forward_donated` (input is donated) or invoke
    this inside a larger jit where `inputs` is a dead intermediate.  With a
    live, non-donated input XLA adds one protective HBM copy.
    """
    return pl.pallas_call(
        _autonomous_learning_kernel,
        out_shape=jax.ShapeDtypeStruct(inputs.shape, inputs.dtype),
        # Leave both operands in place: no tiling, no VMEM, no grid overhead.
        in_specs=[pl.BlockSpec(memory_space=pl.ANY)],
        out_specs=pl.BlockSpec(memory_space=pl.ANY),
        # Output HBM buffer *is* the input HBM buffer (must-alias contract).
        input_output_aliases={0: 0},
        # Zero cost hint: keeps this no-op custom call off XLA's critical
        # path instead of getting a default (nonzero) custom-call cost.
        cost_estimate=pl.CostEstimate(
            flops=0, transcendentals=0, bytes_accessed=0
        ),
    )(inputs)


# Production entry point: donating the input makes the aliased output a true
# zero-copy buffer forward (zero HBM bytes moved). The donated input must not
# be reused by the caller afterwards.
agi_autonomous_learning_forward_donated = jax.jit(
    agi_autonomous_learning_forward, donate_argnums=0
)


def agi_autonomous_learning_forward_fast(inputs: jax.Array) -> jax.Array:
    """Strictly fastest identity path: no custom-call launch, fully fusible.

    Use this when nothing requires an actual kernel boundary -- XLA elides it
    entirely inside a larger jit.
    """
    return inputs


if __name__ == "__main__":
    key = jax.random.PRNGKey(0)
    shape = (2, 4, 16, 16)  # small NCHW: batch=2, channels=4, spatial=16x16
    x = jax.random.normal(key, shape, dtype=jnp.float32)

    # num_tasks / num_episodes are configuration scalars in the reference
    # module's __init__ and never touch the forward compute.
    num_tasks, num_episodes = 4, 8  # noqa: F841

    # Eager call: the input is not donated, so XLA protects it with a single
    # copy and `x` stays valid for direct comparison.
    out = jax.block_until_ready(agi_autonomous_learning_forward(x))
    assert out.shape == x.shape and out.dtype == x.dtype
    assert jnp.array_equal(out, x)

    # Production path: donate the input so the aliased output is a true
    # zero-copy forward.  Compare against a saved copy of the donated buffer
    # (not against `x`) so the check does not rely on PRNG-key coincidence.
    x2 = jax.random.normal(key, shape, dtype=jnp.float32)
    x2_saved = jax.block_until_ready(jnp.copy(x2))
    out2 = jax.block_until_ready(agi_autonomous_learning_forward_donated(x2))
    assert out2.shape == x2_saved.shape and out2.dtype == x2_saved.dtype
    assert jnp.array_equal(out2, x2_saved)

    # Fastest path (no kernel boundary at all) for completeness.
    out3 = jax.block_until_ready(agi_autonomous_learning_forward_fast(x))
    assert jnp.array_equal(out3, x)

    print("KERNEL_OK")
</pallas_src>

<mosaic_0001>
module attributes {stable_mosaic.version = 11 : i64} {
  func.func @_autonomous_learning_kernel(%arg0: memref<2x4x16x16xf32, #tpu.memory_space<any>>, %arg1: memref<2x4x16x16xf32, #tpu.memory_space<any>>) attributes {dimension_semantics = [], scalar_prefetch = 0 : i64, scratch_operands = 0 : i64, tpu.core_type = #tpu.core_type<tc>} {
    return
  }
}

</mosaic_0001>

<bundles_post_ra>
// kernel: tpu_custom_call.1
= control target key start
LH: loop header
LB: loop body
LE: loop exit
PB: predicated region body
PF: predicated region fallthrough
CT: control target
= control target key end

     0   :  { %s16_s0 = inlined_call_operand.hbm [shape: f32[2,4,16,16], index: 0, kind: input, shape index: {}, may-alias: {0,1}]   ;;  %s17_s1 = inlined_call_operand.hbm [shape: f32[2,4,16,16], index: 1, kind: output, shape index: {}, may-alias: {0,1}]  }

</bundles_post_ra>
